<compile_context>
chip_gen: v7x
topology: tpu7x:2x2x1
jax: 0.10.0
libtpu: 0.0.40
codegen_flags: <defaults>
</compile_context>

<pallas_src>
import jax
import jax.numpy as jnp
from jax.experimental import pallas as pl
from jax.experimental.pallas import tpu as pltpu


def _round_up(x, m):
    return ((x + m - 1) // m) * m


def _vmem_capacity_bytes(default=64 * 1024 * 1024):
    """Generation-aware VMEM capacity (128 MiB on v5e/v6e, 64 MiB on v7x)."""
    try:
        info = pltpu.get_tpu_info()
        cap = getattr(info, "vmem_capacity_bytes", None)
        if cap:
            return int(cap)
    except Exception:
        pass
    return default


def ffn_kernel(x_ref, w1_ref, b1_ref, w2_ref, b2_ref, o_ref):
    # ---- Linear(in->hid) with eval-BatchNorm + b1 pre-folded into (W1, bias1) ----
    # bf16 MXU operands, f32 accumulation.
    x = x_ref[...].astype(jnp.bfloat16)
    h = jnp.dot(x, w1_ref[...], preferred_element_type=jnp.float32)
    h = h + b1_ref[...]                          # (1, Hp) broadcasts over rows, f32

    # ---- ReLU ----
    h = jnp.maximum(h, 0.0)

    # ---- Dropout: identity in eval mode ----

    # ---- Linear(hid->out) ----
    y = jnp.dot(h.astype(jnp.bfloat16), w2_ref[...],
                preferred_element_type=jnp.float32)
    y = y + b2_ref[...]

    # ---- F.normalize(dim=1): clamp on sq (1e-24) == clamp on norm (1e-12) ----
    sq = jnp.sum(y * y, axis=-1, keepdims=True)
    inv = jax.lax.rsqrt(jnp.maximum(sq, 1e-24))  # EUP slot, keeps VALU free
    o_ref[...] = (y * inv).astype(o_ref.dtype)


def prepare_ffn_params(w1, b1, gamma, beta, running_mean, running_var, w2, b2,
                       *, eps=1e-5):
    """One-time preprocessing; cache the returned dict across calls.

    Folds eval-BatchNorm + b1 into the first matmul, transposes the weights,
    zero-pads hidden/output feature dims to multiples of 128 (lane-dense) and
    stores the matmul weights in bf16.  Zero padding is mathematically inert
    for the whole pipeline including the L2 norm.
    """
    f32 = jnp.float32
    w1 = jnp.asarray(w1, f32); b1 = jnp.asarray(b1, f32)
    gamma = jnp.asarray(gamma, f32); beta = jnp.asarray(beta, f32)
    running_mean = jnp.asarray(running_mean, f32)
    running_var = jnp.asarray(running_var, f32)
    w2 = jnp.asarray(w2, f32); b2 = jnp.asarray(b2, f32)

    d_hid, d_in = w1.shape
    d_out = w2.shape[0]

    scale = gamma / jnp.sqrt(running_var + eps)            # [H]
    w1_fold = w1.T * scale[None, :]                        # [D_in, H], column-scaled
    bias1 = scale * b1 + (beta - running_mean * scale)     # [H]

    d_hid_p = _round_up(d_hid, 128)
    d_out_p = _round_up(d_out, 128)

    w1_p = jnp.zeros((d_in, d_hid_p), jnp.bfloat16).at[:, :d_hid].set(
        w1_fold.astype(jnp.bfloat16))
    b1_p = jnp.zeros((1, d_hid_p), f32).at[0, :d_hid].set(bias1)
    w2_p = jnp.zeros((d_hid_p, d_out_p), jnp.bfloat16).at[:d_hid, :d_out].set(
        w2.T.astype(jnp.bfloat16))
    b2_p = jnp.zeros((1, d_out_p), f32).at[0, :d_out].set(b2)

    return {"w1": w1_p, "b1": b1_p, "w2": w2_p, "b2": b2_p, "d_out": d_out}


def feed_forward_network_apply(x, params, *, block_n=512):
    """x: [N, D_in]. params: output of prepare_ffn_params. Returns [N, D_out] f32."""
    w1_p, b1_p, w2_p, b2_p = params["w1"], params["b1"], params["w2"], params["b2"]
    d_out = params["d_out"]
    N, d_in = x.shape
    assert w1_p.shape[0] == d_in, "x feature dim mismatch"
    d_hid_p = w1_p.shape[1]
    d_out_p = w2_p.shape[1]

    # ---- Rows: pad only to a multiple of 8; the grid handles a partial last tile. ----
    n_p = _round_up(max(N, 1), 8)
    if n_p != N:
        x = jnp.pad(x, ((0, n_p - N), (0, 0)))

    block_n = max(8, min(_round_up(block_n, 8), n_p))
    # Prefer >=2 row tiles so ("parallel",) can shard across both v7x TensorCores.
    while block_n > 8 and pl.cdiv(n_p, block_n) < 2:
        block_n = max(8, _round_up(block_n // 2, 8))
    grid = (pl.cdiv(n_p, block_n),)

    # ---- VMEM budget: generation-aware cap with headroom for compiler scratch. ----
    vmem_cap = _vmem_capacity_bytes()
    weight_bytes = (w1_p.size + w2_p.size) * 2 + (b1_p.size + b2_p.size) * 4
    io_bytes = block_n * (d_in * x.dtype.itemsize + d_out_p * 4)
    interm_bytes = block_n * (d_hid_p * 6 + d_out_p * 4 + d_in * 2)
    needed = 2 * weight_bytes + 2 * io_bytes + interm_bytes
    vmem_limit = int(min(max(2 * needed, 16 * 1024 * 1024),
                         max(vmem_cap - 8 * 1024 * 1024, 32 * 1024 * 1024)))

    cost = pl.CostEstimate(
        flops=2 * n_p * (d_in * d_hid_p + d_hid_p * d_out_p),
        transcendentals=n_p,
        bytes_accessed=int(n_p * d_in * x.dtype.itemsize + weight_bytes
                           + n_p * d_out_p * 4),
    )

    def run(single_buffer_weights):
        if single_buffer_weights:
            # Grid-invariant weights only need a single VMEM buffer (halves resident
            # weight VMEM; matters most against v7x's 64 MiB VMEM).
            def wspec(shape):
                return pl.BlockSpec(shape, lambda i: (0, 0),
                                    pipeline_mode=pl.Buffered(1))
        else:
            def wspec(shape):
                return pl.BlockSpec(shape, lambda i: (0, 0))

        return pl.pallas_call(
            ffn_kernel,
            out_shape=jax.ShapeDtypeStruct((n_p, d_out_p), jnp.float32),
            grid_spec=pltpu.PrefetchScalarGridSpec(
                num_scalar_prefetch=0,
                grid=grid,
                in_specs=[
                    # x row tile; full-extent feature block -> no feature-pad copy of x.
                    pl.BlockSpec((block_n, d_in), lambda i: (i, 0)),
                    wspec((d_in, d_hid_p)),       # W1 (BN-folded, bf16), whole
                    wspec((1, d_hid_p)),          # folded bias1 (f32)
                    wspec((d_hid_p, d_out_p)),    # W2^T (bf16), whole
                    wspec((1, d_out_p)),          # b2 (f32)
                ],
                out_specs=pl.BlockSpec((block_n, d_out_p), lambda i: (i, 0)),
            ),
            compiler_params=pltpu.CompilerParams(
                dimension_semantics=("parallel",),
                vmem_limit_bytes=vmem_limit,
            ),
            cost_estimate=cost,
        )(x, w1_p, b1_p, w2_p, b2_p)

    try:
        out_p = jax.block_until_ready(run(single_buffer_weights=True))
    except Exception:
        # Fall back to default double-buffered weight specs if this JAX/Mosaic build
        # rejects pipeline_mode on top-level pallas_call BlockSpecs.
        out_p = run(single_buffer_weights=False)

    return out_p[:N, :d_out]


def feed_forward_network(x, w1, b1, gamma, beta, running_mean, running_var,
                         w2, b2, *, eps=1e-5, block_n=512):
    """Convenience one-shot wrapper (prepare + apply)."""
    params = prepare_ffn_params(w1, b1, gamma, beta, running_mean, running_var,
                                w2, b2, eps=eps)
    return feed_forward_network_apply(x, params, block_n=block_n)


def reference_jax(x, w1, b1, gamma, beta, running_mean, running_var, w2, b2, eps=1e-5):
    h = x @ w1.T + b1
    h = gamma * (h - running_mean) / jnp.sqrt(running_var + eps) + beta
    h = jnp.maximum(h, 0.0)
    y = h @ w2.T + b2
    norm = jnp.sqrt(jnp.sum(y * y, axis=1, keepdims=True))
    return y / jnp.maximum(norm, 1e-12)


if __name__ == "__main__":
    key = jax.random.PRNGKey(0)
    k_x, k_w1, k_b1, k_w2, k_b2, k_rm, k_rv = jax.random.split(key, 7)

    # Small shapes consistent with the module defaults:
    # input_dim=32 -> hidden_dim=32 (defaults to input_dim), output_dim=128.
    N, D_IN, D_HID, D_OUT = 8, 32, 32, 128

    x = jax.random.normal(k_x, (N, D_IN), dtype=jnp.float32)

    w1 = jax.random.normal(k_w1, (D_HID, D_IN), dtype=jnp.float32) * 0.1
    b1 = jax.random.normal(k_b1, (D_HID,), dtype=jnp.float32) * 0.1
    w2 = jax.random.normal(k_w2, (D_OUT, D_HID), dtype=jnp.float32) * 0.1
    b2 = jax.random.normal(k_b2, (D_OUT,), dtype=jnp.float32) * 0.1

    gamma = jnp.ones((D_HID,), dtype=jnp.float32)
    beta = jnp.zeros((D_HID,), dtype=jnp.float32)
    running_mean = jax.random.normal(k_rm, (D_HID,), dtype=jnp.float32) * 0.1
    running_var = jax.random.uniform(k_rv, (D_HID,), dtype=jnp.float32,
                                     minval=0.5, maxval=1.5)

    # One-time preprocessing (cache across calls), then apply the kernel.
    params = prepare_ffn_params(w1, b1, gamma, beta, running_mean, running_var, w2, b2)
    out = feed_forward_network_apply(x, params)
    out = jax.block_until_ready(out)

    ref = reference_jax(x, w1, b1, gamma, beta, running_mean, running_var, w2, b2)
    assert out.shape == (N, D_OUT)
    # bf16 MXU operands with f32 accumulation -> loosened tolerance vs. the f32 reference.
    assert jnp.allclose(out, ref, atol=2e-2, rtol=2e-2), "mismatch vs reference"
    # Output rows must be (near) unit-norm.
    norms = jnp.sqrt(jnp.sum(out * out, axis=1))
    assert jnp.allclose(norms, 1.0, atol=1e-3), "output rows not L2-normalized"

    print("KERNEL_OK")
</pallas_src>

<mosaic_0001>
module attributes {stable_mosaic.version = 11 : i64} {
  func.func @ffn_kernel(%arg0: i32, %arg1: memref<8x32xf32, #tpu.memory_space<vmem>>, %arg2: memref<32x128xbf16, #tpu.memory_space<vmem>>, %arg3: memref<1x128xf32, #tpu.memory_space<vmem>>, %arg4: memref<128x128xbf16, #tpu.memory_space<vmem>>, %arg5: memref<1x128xf32, #tpu.memory_space<vmem>>, %arg6: memref<8x128xf32, #tpu.memory_space<vmem>>) attributes {dimension_semantics = [#tpu.dimension_semantics<parallel>], iteration_bounds = array<i64: 1>, scalar_prefetch = 0 : i64, scratch_operands = 0 : i64, tpu.core_type = #tpu.core_type<tc>, window_params = [{transform_indices = @transform_0, window_bounds = array<i64: 8, 32>}, {pipeline_mode = #tpu.pipeline_mode<synchronous>, transform_indices = @transform_1, window_bounds = array<i64: 32, 128>}, {pipeline_mode = #tpu.pipeline_mode<synchronous>, transform_indices = @transform_2, window_bounds = array<i64: 1, 128>}, {pipeline_mode = #tpu.pipeline_mode<synchronous>, transform_indices = @transform_3, window_bounds = array<i64: 128, 128>}, {pipeline_mode = #tpu.pipeline_mode<synchronous>, transform_indices = @transform_4, window_bounds = array<i64: 1, 128>}, {transform_indices = @transform_5, window_bounds = array<i64: 8, 128>}]} {
    %c0 = arith.constant 0 : index
    %c0_0 = arith.constant 0 : index
    %0 = vector.load %arg1[%c0, %c0_0] : memref<8x32xf32, #tpu.memory_space<vmem>>, vector<8x32xf32>
    %1 = arith.truncf %0 : vector<8x32xf32> to vector<8x32xbf16>
    %c0_1 = arith.constant 0 : index
    %c0_2 = arith.constant 0 : index
    %2 = vector.load %arg2[%c0_1, %c0_2] : memref<32x128xbf16, #tpu.memory_space<vmem>>, vector<32x128xbf16>
    %cst = arith.constant dense<0.000000e+00> : vector<8x128xf32>
    %3 = tpu.matmul %1, %2, %cst {dimension_numbers = #tpu.dot_dimension_numbers<[1], [0], [0], [1], [0, 0, 1, 1], [], []>} : vector<8x32xbf16>, vector<32x128xbf16>, vector<8x128xf32> -> vector<8x128xf32>
    %c0_3 = arith.constant 0 : index
    %c0_4 = arith.constant 0 : index
    %4 = vector.load %arg3[%c0_3, %c0_4] : memref<1x128xf32, #tpu.memory_space<vmem>>, vector<1x128xf32>
    %5 = vector.broadcast %4 : vector<1x128xf32> to vector<8x128xf32>
    %6 = arith.addf %3, %5 : vector<8x128xf32>
    %cst_5 = arith.constant 0.000000e+00 : f32
    %7 = vector.broadcast %cst_5 : f32 to vector<8x128xf32>
    %8 = arith.maximumf %6, %7 : vector<8x128xf32>
    %9 = arith.truncf %8 : vector<8x128xf32> to vector<8x128xbf16>
    %c0_6 = arith.constant 0 : index
    %c0_7 = arith.constant 0 : index
    %10 = vector.load %arg4[%c0_6, %c0_7] : memref<128x128xbf16, #tpu.memory_space<vmem>>, vector<128x128xbf16>
    %cst_8 = arith.constant dense<0.000000e+00> : vector<8x128xf32>
    %11 = tpu.matmul %9, %10, %cst_8 {dimension_numbers = #tpu.dot_dimension_numbers<[1], [0], [0], [1], [0, 0, 1, 1], [], []>} : vector<8x128xbf16>, vector<128x128xbf16>, vector<8x128xf32> -> vector<8x128xf32>
    %c0_9 = arith.constant 0 : index
    %c0_10 = arith.constant 0 : index
    %12 = vector.load %arg5[%c0_9, %c0_10] : memref<1x128xf32, #tpu.memory_space<vmem>>, vector<1x128xf32>
    %13 = vector.broadcast %12 : vector<1x128xf32> to vector<8x128xf32>
    %14 = arith.addf %11, %13 : vector<8x128xf32>
    %15 = arith.mulf %14, %14 : vector<8x128xf32>
    %cst_11 = arith.constant dense<0.000000e+00> : vector<8xf32>
    %16 = vector.multi_reduction <add>, %15, %cst_11 [1] : vector<8x128xf32> to vector<8xf32>
    %17 = vector.shape_cast %16 : vector<8xf32> to vector<8x1xf32>
    %cst_12 = arith.constant 1.000000e-24 : f32
    %18 = vector.broadcast %cst_12 : f32 to vector<8x1xf32>
    %19 = arith.maximumf %17, %18 : vector<8x1xf32>
    %20 = math.rsqrt %19 : vector<8x1xf32>
    %21 = vector.broadcast %20 : vector<8x1xf32> to vector<8x128xf32>
    %22 = arith.mulf %14, %21 : vector<8x128xf32>
    %c0_13 = arith.constant 0 : index
    %c0_14 = arith.constant 0 : index
    %23 = vector.load %arg6[%c0_13, %c0_14] : memref<8x128xf32, #tpu.memory_space<vmem>>, vector<8x128xf32>
    tpu.vector_store %arg6[%c0_13, %c0_14], %22 {strides = array<i32>} : memref<8x128xf32, #tpu.memory_space<vmem>>, vector<8x128xf32>,
    return
  }
  func.func @transform_0(%arg0: i32) -> (i32, i32) {
    %c0_i32 = arith.constant 0 : i32
    %c0_i32_0 = arith.constant 0 : i32
    return %arg0, %c0_i32 : i32, i32
  }
  func.func @transform_1(%arg0: i32) -> (i32, i32) {
    %c0_i32 = arith.constant 0 : i32
    %c0_i32_0 = arith.constant 0 : i32
    %c0_i32_1 = arith.constant 0 : i32
    return %c0_i32, %c0_i32_0 : i32, i32
  }
  func.func @transform_2(%arg0: i32) -> (i32, i32) {
    %c0_i32 = arith.constant 0 : i32
    %c0_i32_0 = arith.constant 0 : i32
    %c0_i32_1 = arith.constant 0 : i32
    return %c0_i32, %c0_i32_0 : i32, i32
  }
  func.func @transform_3(%arg0: i32) -> (i32, i32) {
    %c0_i32 = arith.constant 0 : i32
    %c0_i32_0 = arith.constant 0 : i32
    %c0_i32_1 = arith.constant 0 : i32
    return %c0_i32, %c0_i32_0 : i32, i32
  }
  func.func @transform_4(%arg0: i32) -> (i32, i32) {
    %c0_i32 = arith.constant 0 : i32
    %c0_i32_0 = arith.constant 0 : i32
    %c0_i32_1 = arith.constant 0 : i32
    return %c0_i32, %c0_i32_0 : i32, i32
  }
  func.func @transform_5(%arg0: i32) -> (i32, i32) {
    %c0_i32 = arith.constant 0 : i32
    %c0_i32_0 = arith.constant 0 : i32
    return %arg0, %c0_i32 : i32, i32
  }
}

module attributes {stable_mosaic.version = 11 : i64} {
  func.func @ffn_kernel(%arg0: i32, %arg1: memref<8x32xf32, #tpu.memory_space<vmem>>, %arg2: memref<32x128xbf16, #tpu.memory_space<vmem>>, %arg3: memref<1x128xf32, #tpu.memory_space<vmem>>, %arg4: memref<128x128xbf16, #tpu.memory_space<vmem>>, %arg5: memref<1x128xf32, #tpu.memory_space<vmem>>, %arg6: memref<8x128xf32, #tpu.memory_space<vmem>>) attributes {dimension_semantics = [#tpu.dimension_semantics<parallel>], iteration_bounds = array<i64: 1>, scalar_prefetch = 0 : i64, scratch_operands = 0 : i64, tpu.core_type = #tpu.core_type<tc>, window_params = [{transform_indices = @transform_0, window_bounds = array<i64: 8, 32>}, {pipeline_mode = #tpu.pipeline_mode<synchronous>, transform_indices = @transform_1, window_bounds = array<i64: 32, 128>}, {pipeline_mode = #tpu.pipeline_mode<synchronous>, transform_indices = @transform_2, window_bounds = array<i64: 1, 128>}, {pipeline_mode = #tpu.pipeline_mode<synchronous>, transform_indices = @transform_3, window_bounds = array<i64: 128, 128>}, {pipeline_mode = #tpu.pipeline_mode<synchronous>, transform_indices = @transform_4, window_bounds = array<i64: 1, 128>}, {transform_indices = @transform_5, window_bounds = array<i64: 8, 128>}]} {
    %c0 = arith.constant 0 : index
    %c0_0 = arith.constant 0 : index
    %0 = vector.load %arg1[%c0, %c0_0] : memref<8x32xf32, #tpu.memory_space<vmem>>, vector<8x32xf32>
    %1 = arith.truncf %0 : vector<8x32xf32> to vector<8x32xbf16>
    %c0_1 = arith.constant 0 : index
    %c0_2 = arith.constant 0 : index
    %2 = vector.load %arg2[%c0_1, %c0_2] : memref<32x128xbf16, #tpu.memory_space<vmem>>, vector<32x128xbf16>
    %cst = arith.constant dense<0.000000e+00> : vector<8x128xf32>
    %3 = tpu.matmul %1, %2, %cst {dimension_numbers = #tpu.dot_dimension_numbers<[1], [0], [0], [1], [0, 0, 1, 1], [], []>} : vector<8x32xbf16>, vector<32x128xbf16>, vector<8x128xf32> -> vector<8x128xf32>
    %c0_3 = arith.constant 0 : index
    %c0_4 = arith.constant 0 : index
    %4 = vector.load %arg3[%c0_3, %c0_4] : memref<1x128xf32, #tpu.memory_space<vmem>>, vector<1x128xf32>
    %5 = vector.broadcast %4 : vector<1x128xf32> to vector<8x128xf32>
    %6 = arith.addf %3, %5 : vector<8x128xf32>
    %cst_5 = arith.constant 0.000000e+00 : f32
    %7 = vector.broadcast %cst_5 : f32 to vector<8x128xf32>
    %8 = arith.maximumf %6, %7 : vector<8x128xf32>
    %9 = arith.truncf %8 : vector<8x128xf32> to vector<8x128xbf16>
    %c0_6 = arith.constant 0 : index
    %c0_7 = arith.constant 0 : index
    %10 = vector.load %arg4[%c0_6, %c0_7] : memref<128x128xbf16, #tpu.memory_space<vmem>>, vector<128x128xbf16>
    %cst_8 = arith.constant dense<0.000000e+00> : vector<8x128xf32>
    %11 = tpu.matmul %9, %10, %cst_8 {dimension_numbers = #tpu.dot_dimension_numbers<[1], [0], [0], [1], [0, 0, 1, 1], [], []>} : vector<8x128xbf16>, vector<128x128xbf16>, vector<8x128xf32> -> vector<8x128xf32>
    %c0_9 = arith.constant 0 : index
    %c0_10 = arith.constant 0 : index
    %12 = vector.load %arg5[%c0_9, %c0_10] : memref<1x128xf32, #tpu.memory_space<vmem>>, vector<1x128xf32>
    %13 = vector.broadcast %12 : vector<1x128xf32> to vector<8x128xf32>
    %14 = arith.addf %11, %13 : vector<8x128xf32>
    %15 = arith.mulf %14, %14 : vector<8x128xf32>
    %cst_11 = arith.constant dense<0.000000e+00> : vector<8xf32>
    %16 = vector.multi_reduction <add>, %15, %cst_11 [1] : vector<8x128xf32> to vector<8xf32>
    %17 = vector.shape_cast %16 : vector<8xf32> to vector<8x1xf32>
    %cst_12 = arith.constant 1.000000e-24 : f32
    %18 = vector.broadcast %cst_12 : f32 to vector<8x1xf32>
    %19 = arith.maximumf %17, %18 : vector<8x1xf32>
    %20 = math.rsqrt %19 : vector<8x1xf32>
    %21 = vector.broadcast %20 : vector<8x1xf32> to vector<8x128xf32>
    %22 = arith.mulf %14, %21 : vector<8x128xf32>
    %c0_13 = arith.constant 0 : index
    %c0_14 = arith.constant 0 : index
    %23 = vector.load %arg6[%c0_13, %c0_14] : memref<8x128xf32, #tpu.memory_space<vmem>>, vector<8x128xf32>
    tpu.vector_store %arg6[%c0_13, %c0_14], %22 {strides = array<i32>} : memref<8x128xf32, #tpu.memory_space<vmem>>, vector<8x128xf32>,
    return
  }
  func.func @transform_0(%arg0: i32) -> (i32, i32) {
    %c0_i32 = arith.constant 0 : i32
    %c0_i32_0 = arith.constant 0 : i32
    return %arg0, %c0_i32 : i32, i32
  }
  func.func @transform_1(%arg0: i32) -> (i32, i32) {
    %c0_i32 = arith.constant 0 : i32
    %c0_i32_0 = arith.constant 0 : i32
    %c0_i32_1 = arith.constant 0 : i32
    return %c0_i32, %c0_i32_0 : i32, i32
  }
  func.func @transform_2(%arg0: i32) -> (i32, i32) {
    %c0_i32 = arith.constant 0 : i32
    %c0_i32_0 = arith.constant 0 : i32
    %c0_i32_1 = arith.constant 0 : i32
    return %c0_i32, %c0_i32_0 : i32, i32
  }
  func.func @transform_3(%arg0: i32) -> (i32, i32) {
    %c0_i32 = arith.constant 0 : i32
    %c0_i32_0 = arith.constant 0 : i32
    %c0_i32_1 = arith.constant 0 : i32
    return %c0_i32, %c0_i32_0 : i32, i32
  }
  func.func @transform_4(%arg0: i32) -> (i32, i32) {
    %c0_i32 = arith.constant 0 : i32
    %c0_i32_0 = arith.constant 0 : i32
    %c0_i32_1 = arith.constant 0 : i32
    return %c0_i32, %c0_i32_0 : i32, i32
  }
  func.func @transform_5(%arg0: i32) -> (i32, i32) {
    %c0_i32 = arith.constant 0 : i32
    %c0_i32_0 = arith.constant 0 : i32
    return %arg0, %c0_i32 : i32, i32
  }
}

</mosaic_0001>

<bundles_post_ra>
// kernel: tpu_custom_call.1
= control target key start
LH: loop header
LB: loop body
LE: loop exit
PB: predicated region body
PF: predicated region fallthrough
CT: control target
= control target key end

     0   :  { %10 = vsyncpa [#allocation3], 0  ;;  %s531_s0 = inlined_call_operand.hbm [shape: f32[8,32], index: 0, kind: input, shape index: {}]   ;;  %s532_s1 = inlined_call_operand.hbm [shape: bf16[32,128], index: 1, kind: input, shape index: {}]   ;;  %s533_s2 = inlined_call_operand.vmem [shape: f32[1,128], index: 2, kind: input, shape index: {}]   ;;  %s534_s3 = inlined_call_operand.hbm [shape: bf16[128,128], index: 3, kind: input, shape index: {}]   ;;  %s535_s4 = inlined_call_operand.vmem [shape: f32[1,128], index: 4, kind: input, shape index: {}]   ;;  %s536_s5 = inlined_call_operand.hbm [shape: f32[8,128], index: 5, kind: output, shape index: {}]  }
   0x1   :  { %11 = vsyncpa [#allocation6], 0 }
   0x2   :  { %12 = vsyncpa [#allocation4], 0  ;;  %s433_s18 = smov [#allocation5]   ;;  %s339_s22 = scalar_lea.hbm %s532_s1, 256 }
   0x3   :  { %s28_s19 = sshll.u32 %s433_s18, 4  ;;  %p340_p0 = scmp.ne.s32.totalorder %s532_s1, %s339_s22  ;;  %s29_s19 = int_to_ptr.vmem [resolvable:$true] %s28_s19 }
   0x4   :  { %p343_p1 = scmp.lt.u32.totalorder %s339_s22, %s532_s1 }
   0x6   :  { %p345_p2 = pnand %p343_p1, %p340_p0 }
   0x8   :  { %348 = shalt.err (!%p345_p2)
}
   0x9   :  { %s349_s27 = scalar_lea.vmem %s29_s19, 256  ;;  %p354_p4 = scmp.lt.s32.totalorder %s29_s19, %s29_s19 }
   0xa   :  { %p350_p3 = scmp.ne.s32.totalorder %s29_s19, %s349_s27  ;;  %p355_p5 = scmp.lt.s32.totalorder %s349_s27, %s349_s27 }
   0xc   :  { %p356_p6 = por %p355_p5, %p354_p4 }
   0xe   :  { %p357_p7 = pnand %p356_p6, %p350_p3 }
  0x10   :  { %360 = shalt.err (!%p357_p7)
}
  0x11   :  { %s434_s28 = smov 64   ;;  %s435_s29 = smov 4  }
  0x12   :  { %34 = dma.hbm_to_vmem [thread:$0]  %s532_s1, 256, %s29_s19, [#allocation6], %s434_s28, %s434_s28, %s435_s29  }
  0x13   :  { %s436_s7 = smov [#allocation2]   ;;  %s437_s9 = smov [#allocation7]  }
  0x14   :  { %s19_s8 = sshll.u32 %s436_s7, 4  ;;  %s42_s10 = sshll.u32 %s437_s9, 4  ;;  %s20_s8 = int_to_ptr.vmem [resolvable:$true] %s19_s8  ;;  %s43_s10 = int_to_ptr.vmem [resolvable:$true] %s42_s10 }
  0x15   :  { %s361_s13 = scalar_lea.hbm %s531_s0, 128 }
  0x16   :  { %p362_p8 = scmp.ne.s32.totalorder %s531_s0, %s361_s13  ;;  %p365_p9 = scmp.lt.u32.totalorder %s361_s13, %s531_s0 }
  0x18   :  { %p367_p10 = pnand %p365_p9, %p362_p8 }
  0x1a   :  { %370 = shalt.err (!%p367_p10)
}
  0x1b   :  { %s371_s1 = scalar_lea.vmem %s20_s8, 128  ;;  %p376_p12 = scmp.lt.s32.totalorder %s20_s8, %s20_s8 }
  0x1c   :  { %p372_p11 = scmp.ne.s32.totalorder %s20_s8, %s371_s1  ;;  %p377_p13 = scmp.lt.s32.totalorder %s371_s1, %s371_s1 }
  0x1e   :  { %p378_p0 = por %p377_p13, %p376_p12 }
  0x20   :  { %p379_p1 = pnand %p378_p0, %p372_p11 }
  0x22   :  { %382 = shalt.err (!%p379_p1)
}
  0x23   :  { %22 = dma.hbm_to_vmem [thread:$0]  %s531_s0, 128, %s20_s8, [#allocation3]  }
  0x24   :  { %s383_s22 = scalar_lea.hbm %s534_s3, 1024 }
  0x25   :  { %p384_p2 = scmp.ne.s32.totalorder %s534_s3, %s383_s22  ;;  %p387_p3 = scmp.lt.u32.totalorder %s383_s22, %s534_s3 }
  0x27   :  { %p389_p4 = pnand %p387_p3, %p384_p2 }
  0x29   :  { %392 = shalt.err (!%p389_p4)
}
  0x2a   :  { %s393_s27 = scalar_lea.vmem %s43_s10, 1024  ;;  %p398_p6 = scmp.lt.s32.totalorder %s43_s10, %s43_s10 }
  0x2b   :  { %p394_p5 = scmp.ne.s32.totalorder %s43_s10, %s393_s27  ;;  %p399_p7 = scmp.lt.s32.totalorder %s393_s27, %s393_s27 }
  0x2d   :  { %p400_p8 = por %p399_p7, %p398_p6 }
  0x2f   :  { %p401_p9 = pnand %p400_p8, %p394_p5 }
  0x31   :  { %404 = shalt.err (!%p401_p9)
}
  0x32   :  { %48 = dma.hbm_to_vmem [thread:$0]  %s534_s3, 1024, %s43_s10, [#allocation6], %s434_s28, %s434_s28, %s435_s29  }
  0x33   :  { %427 = dma.done.wait [#allocation3], 128  }
  0x34   :  { %428 = vsyncadd [#allocation3], 4294967168 }
  0x35   :  { %429 = dma.done.wait [#allocation6], 1280  }
  0x36   :  { %430 = vsyncadd [#allocation6], 4294966016  ;;  %v438_v0 = vmov 0.0   ;;  %vm439_vm0 = vmmov 0   ;;  %v327_v1 = vld [vmem:[#allocation5] sm:$0xff]   ;;  %v328_v2 = vld [vmem:[#allocation5 + $0x8] sm:$0xff]  }
  0x37   :  { %291 = vmatprep.subr.bf16.mxu0 %v438_v0  ;;  %295 = vmatprep.mubr.msk.bf16.mxu0 %vm439_vm0, %v438_v0  ;;  %v61_v3 = vld [vmem:[#allocation2] sm:$0xff]  ;;  %v329_v4 = vld [vmem:[#allocation7] sm:$0xff]   ;;  %vm86_vm1 = vcmask 261120   ;;  %v331_v7 = vld [vmem:[#allocation7 + $0x10] sm:$0xff]  }
  0x38   :  { %299 = vmatprep.subr.bf16.mxu1 %v438_v0  ;;  %315 = vmatprep.mubr.msk.bf16.mxu1 %vm439_vm0, %v438_v0  ;;  %v62_v5 = vpack.c.bf16 %v61_v3, %v61_v3  ;;  %v330_v6 = vld [vmem:[#allocation7 + $0x8] sm:$0xff]   ;;  %v332_v8 = vld [vmem:[#allocation7 + $0x18] sm:$0xff]   ;;  %v333_v9 = vld [vmem:[#allocation7 + $0x20] sm:$0xff]  }
  0x39   :  { %292 = vmatpush3.bf16.msra.mxu0 %v327_v1  ;;  %300 = vmatpush3.bf16.msra.mxu1 %v329_v4  ;;  %v334_v10 = vld [vmem:[#allocation7 + $0x28] sm:$0xff]   ;;  %v335_v11 = vld [vmem:[#allocation7 + $0x30] sm:$0xff]   ;;  %v336_v12 = vld [vmem:[#allocation7 + $0x38] sm:$0xff]  }
  0x3a   :  { %293 = vmatprep.subr.bf16.mxu0 %v438_v0  ;;  %301 = vmatprep.subr.bf16.mxu1 %v438_v0  ;;  %v266_v13 = vld [vmem:[%s533_s2] ss:$0 sm:$0xff]  ;;  %s440_s2 = smov [#allocation8]  }
  0x3b   :  { %v270_v21 = vld [vmem:[%s535_s4] ss:$0 sm:$0xff]  ;;  %s256_s7 = sshll.u32 %s440_s2, 4  ;;  %s257_s7 = int_to_ptr.vmem [resolvable:$true] %s256_s7 }
  0x3c   :  { %s405_s8 = scalar_lea.vmem %s257_s7, 128  ;;  %p410_p11 = scmp.lt.s32.totalorder %s257_s7, %s257_s7 }
  0x3d   :  { %294 = vmatpush3.bf16.msra.mxu0 %v328_v2  ;;  %302 = vmatpush3.bf16.msra.mxu1 %v330_v6  ;;  %p406_p10 = scmp.ne.s32.totalorder %s257_s7, %s405_s8  ;;  %p411_p12 = scmp.lt.s32.totalorder %s405_s8, %s405_s8 }
  0x3e   :  { %303 = vmatprep.subr.bf16.mxu1 %v438_v0 }
  0x3f   :  { %p412_p13 = por %p411_p12, %p410_p11 }
  0x40   :  { %296 = vmatmul.mubr.msk.bf16.vlgmr.msra.gmra.mrb[0].mxu0 %vm86_vm1, %v62_v5 }
  0x41   :  { %304 = vmatpush3.bf16.msra.mxu1 %v331_v7  ;;  %p413_p0 = pnand %p412_p13, %p406_p10 }
  0x42   :  { %305 = vmatprep.subr.bf16.mxu1 %v438_v0 }
  0x45   :  { %306 = vmatpush3.bf16.msra.mxu1 %v332_v8 }
  0x46   :  { %307 = vmatprep.subr.bf16.mxu1 %v438_v0 }
  0x49   :  { %308 = vmatpush3.bf16.msra.mxu1 %v333_v9 }
  0x4a   :  { %309 = vmatprep.subr.bf16.mxu1 %v438_v0 }
  0x4d   :  { %310 = vmatpush3.bf16.msra.mxu1 %v334_v10 }
  0x4e   :  { %311 = vmatprep.subr.bf16.mxu1 %v438_v0 }
  0x51   :  { %312 = vmatpush3.bf16.msra.mxu1 %v335_v11 }
  0x52   :  { %313 = vmatprep.subr.bf16.mxu1 %v438_v0 }
  0x55   :  { %314 = vmatpush3.bf16.msra.mxu1 %v336_v12 }
 0x113   :  { %v124_v14 = vpop.f32.mrb[0].mxu0 }
 0x114   :  { %v125_v15 = vadd.f32 %v266_v13, %v124_v14  ;;  %v297_v16 = vpop.f32.mrb[1].mxu0 }
 0x115   :  { %v127_v17 = vpop.f32.mrb[2].mxu0 }
 0x116   :  { %v130_v18 = vmax.f32 %v125_v15, 0.0  ;;  %v298_v19 = vpop.f32.mrb[3].mxu0 }
 0x118   :  { %v131_v20 = vpack.c.bf16 %v130_v18, %v130_v18 }
 0x11a   :  { %316 = vmatmul.mubr.bf16.vlgmr.msra.gmra.mrb[0].mxu1 %v131_v20 }
 0x1ed   :  { %v237_v22 = vpop.f32.mrb[0].mxu1 }
 0x1ee   :  { %v238_v23 = vadd.f32 %v270_v21, %v237_v22  ;;  %v317_v24 = vpop.f32.mrb[1].mxu1 }
 0x1ef   :  { %v240_v25 = vpop.f32.mrb[2].mxu1 }
 0x1f0   :  { %v318_v26 = vpop.f32.mrb[3].mxu1  ;;  %v243_v27 = vmul.f32 %v238_v23, %v238_v23 }
 0x1f2   :  { %244 = vadd.xlane.f32.xlu0 %v243_v27 }
 0x27f   :  { %v245_v28 = vpop.xlane.xlu0 %244 }
 0x280   :  { %v246_v29 = vmax.f32 %v245_v28, 1e-24 }
 0x282   :  { %337 = vrsqrt.f32 %v246_v29 }
 0x28c   :  { %v338_v30 = vpop.eup %337 }
 0x28d   :  { %v248_v31 = vmul.f32 %v338_v30, %v238_v23 }
 0x28f   :  { %249 = vst [vmem:[#allocation8] sm:$0xff] %v248_v31 }
 0x290   :  { %416 = shalt.err (!%p413_p0)
}
 0x291   :  { %s417_s10 = scalar_lea.hbm %s536_s5, 128 }
 0x292   :  { %p418_p1 = scmp.ne.s32.totalorder %s536_s5, %s417_s10  ;;  %p421_p2 = scmp.lt.u32.totalorder %s417_s10, %s536_s5 }
 0x294   :  { %p423_p3 = pnand %p421_p2, %p418_p1 }
 0x296   :  { %426 = shalt.err (!%p423_p3)
}
 0x297   :  { %259 = dma.vmem_to_hbm [thread:$0]  %s257_s7, 128, %s536_s5, [#allocation4]  }
 0x298   :  { %431 = dma.done.wait [#allocation4], 128  }
 0x299   :  { %432 = vsyncadd [#allocation4], 4294967168 }
 0x29a   :  { %263 = vsyncpa [#allocation3], 1 }
 0x29b   :  { %264 = vsyncpa [#allocation6], 1 }
 0x29c   :  { %265 = vsyncpa [#allocation4], 1 }

// kernel: tpu_custom_call.1
= control target key start
LH: loop header
LB: loop body
LE: loop exit
PB: predicated region body
PF: predicated region fallthrough
CT: control target
= control target key end

     0   :  { %10 = vsyncpa [#allocation3], 0  ;;  %s531_s0 = inlined_call_operand.hbm [shape: f32[8,32], index: 0, kind: input, shape index: {}]   ;;  %s532_s1 = inlined_call_operand.hbm [shape: bf16[32,128], index: 1, kind: input, shape index: {}]   ;;  %s533_s2 = inlined_call_operand.vmem [shape: f32[1,128], index: 2, kind: input, shape index: {}]   ;;  %s534_s3 = inlined_call_operand.hbm [shape: bf16[128,128], index: 3, kind: input, shape index: {}]   ;;  %s535_s4 = inlined_call_operand.vmem [shape: f32[1,128], index: 4, kind: input, shape index: {}]   ;;  %s536_s5 = inlined_call_operand.hbm [shape: f32[8,128], index: 5, kind: output, shape index: {}]  }
   0x1   :  { %11 = vsyncpa [#allocation6], 0 }
   0x2   :  { %12 = vsyncpa [#allocation4], 0  ;;  %s433_s18 = smov [#allocation5]   ;;  %s339_s22 = scalar_lea.hbm %s532_s1, 256 }
   0x3   :  { %s28_s19 = sshll.u32 %s433_s18, 4  ;;  %p340_p0 = scmp.ne.s32.totalorder %s532_s1, %s339_s22  ;;  %s29_s19 = int_to_ptr.vmem [resolvable:$true] %s28_s19 }
   0x4   :  { %p343_p1 = scmp.lt.u32.totalorder %s339_s22, %s532_s1 }
   0x6   :  { %p345_p2 = pnand %p343_p1, %p340_p0 }
   0x8   :  { %348 = shalt.err (!%p345_p2)
}
   0x9   :  { %s349_s27 = scalar_lea.vmem %s29_s19, 256  ;;  %p354_p4 = scmp.lt.s32.totalorder %s29_s19, %s29_s19 }
   0xa   :  { %p350_p3 = scmp.ne.s32.totalorder %s29_s19, %s349_s27  ;;  %p355_p5 = scmp.lt.s32.totalorder %s349_s27, %s349_s27 }
   0xc   :  { %p356_p6 = por %p355_p5, %p354_p4 }
   0xe   :  { %p357_p7 = pnand %p356_p6, %p350_p3 }
  0x10   :  { %360 = shalt.err (!%p357_p7)
}
  0x11   :  { %s434_s28 = smov 64   ;;  %s435_s29 = smov 4  }
  0x12   :  { %34 = dma.hbm_to_vmem [thread:$0]  %s532_s1, 256, %s29_s19, [#allocation6], %s434_s28, %s434_s28, %s435_s29  }
  0x13   :  { %s436_s7 = smov [#allocation2]   ;;  %s437_s9 = smov [#allocation7]  }
  0x14   :  { %s19_s8 = sshll.u32 %s436_s7, 4  ;;  %s42_s10 = sshll.u32 %s437_s9, 4  ;;  %s20_s8 = int_to_ptr.vmem [resolvable:$true] %s19_s8  ;;  %s43_s10 = int_to_ptr.vmem [resolvable:$true] %s42_s10 }
  0x15   :  { %s361_s13 = scalar_lea.hbm %s531_s0, 128 }
  0x16   :  { %p362_p8 = scmp.ne.s32.totalorder %s531_s0, %s361_s13  ;;  %p365_p9 = scmp.lt.u32.totalorder %s361_s13, %s531_s0 }
  0x18   :  { %p367_p10 = pnand %p365_p9, %p362_p8 }
  0x1a   :  { %370 = shalt.err (!%p367_p10)
}
  0x1b   :  { %s371_s1 = scalar_lea.vmem %s20_s8, 128  ;;  %p376_p12 = scmp.lt.s32.totalorder %s20_s8, %s20_s8 }
  0x1c   :  { %p372_p11 = scmp.ne.s32.totalorder %s20_s8, %s371_s1  ;;  %p377_p13 = scmp.lt.s32.totalorder %s371_s1, %s371_s1 }
  0x1e   :  { %p378_p0 = por %p377_p13, %p376_p12 }
  0x20   :  { %p379_p1 = pnand %p378_p0, %p372_p11 }
  0x22   :  { %382 = shalt.err (!%p379_p1)
}
  0x23   :  { %22 = dma.hbm_to_vmem [thread:$0]  %s531_s0, 128, %s20_s8, [#allocation3]  }
  0x24   :  { %s383_s22 = scalar_lea.hbm %s534_s3, 1024 }
  0x25   :  { %p384_p2 = scmp.ne.s32.totalorder %s534_s3, %s383_s22  ;;  %p387_p3 = scmp.lt.u32.totalorder %s383_s22, %s534_s3 }
  0x27   :  { %p389_p4 = pnand %p387_p3, %p384_p2 }
  0x29   :  { %392 = shalt.err (!%p389_p4)
}
  0x2a   :  { %s393_s27 = scalar_lea.vmem %s43_s10, 1024  ;;  %p398_p6 = scmp.lt.s32.totalorder %s43_s10, %s43_s10 }
  0x2b   :  { %p394_p5 = scmp.ne.s32.totalorder %s43_s10, %s393_s27  ;;  %p399_p7 = scmp.lt.s32.totalorder %s393_s27, %s393_s27 }
  0x2d   :  { %p400_p8 = por %p399_p7, %p398_p6 }
  0x2f   :  { %p401_p9 = pnand %p400_p8, %p394_p5 }
  0x31   :  { %404 = shalt.err (!%p401_p9)
}
  0x32   :  { %48 = dma.hbm_to_vmem [thread:$0]  %s534_s3, 1024, %s43_s10, [#allocation6], %s434_s28, %s434_s28, %s435_s29  }
  0x33   :  { %427 = dma.done.wait [#allocation3], 128  }
  0x34   :  { %428 = vsyncadd [#allocation3], 4294967168 }
  0x35   :  { %429 = dma.done.wait [#allocation6], 1280  }
  0x36   :  { %430 = vsyncadd [#allocation6], 4294966016  ;;  %v438_v0 = vmov 0.0   ;;  %vm439_vm0 = vmmov 0   ;;  %v327_v1 = vld [vmem:[#allocation5] sm:$0xff]   ;;  %v328_v2 = vld [vmem:[#allocation5 + $0x8] sm:$0xff]  }
  0x37   :  { %291 = vmatprep.subr.bf16.mxu0 %v438_v0  ;;  %295 = vmatprep.mubr.msk.bf16.mxu0 %vm439_vm0, %v438_v0  ;;  %v61_v3 = vld [vmem:[#allocation2] sm:$0xff]  ;;  %v329_v4 = vld [vmem:[#allocation7] sm:$0xff]   ;;  %vm86_vm1 = vcmask 261120   ;;  %v331_v7 = vld [vmem:[#allocation7 + $0x10] sm:$0xff]  }
  0x38   :  { %299 = vmatprep.subr.bf16.mxu1 %v438_v0  ;;  %315 = vmatprep.mubr.msk.bf16.mxu1 %vm439_vm0, %v438_v0  ;;  %v62_v5 = vpack.c.bf16 %v61_v3, %v61_v3  ;;  %v330_v6 = vld [vmem:[#allocation7 + $0x8] sm:$0xff]   ;;  %v332_v8 = vld [vmem:[#allocation7 + $0x18] sm:$0xff]   ;;  %v333_v9 = vld [vmem:[#allocation7 + $0x20] sm:$0xff]  }
  0x39   :  { %292 = vmatpush3.bf16.msra.mxu0 %v327_v1  ;;  %300 = vmatpush3.bf16.msra.mxu1 %v329_v4  ;;  %v334_v10 = vld [vmem:[#allocation7 + $0x28] sm:$0xff]   ;;  %v335_v11 = vld [vmem:[#allocation7 + $0x30] sm:$0xff]   ;;  %v336_v12 = vld [vmem:[#allocation7 + $0x38] sm:$0xff]  }
  0x3a   :  { %293 = vmatprep.subr.bf16.mxu0 %v438_v0  ;;  %301 = vmatprep.subr.bf16.mxu1 %v438_v0  ;;  %v266_v13 = vld [vmem:[%s533_s2] ss:$0 sm:$0xff]  ;;  %s440_s2 = smov [#allocation8]  }
  0x3b   :  { %v270_v21 = vld [vmem:[%s535_s4] ss:$0 sm:$0xff]  ;;  %s256_s7 = sshll.u32 %s440_s2, 4  ;;  %s257_s7 = int_to_ptr.vmem [resolvable:$true] %s256_s7 }
  0x3c   :  { %s405_s8 = scalar_lea.vmem %s257_s7, 128  ;;  %p410_p11 = scmp.lt.s32.totalorder %s257_s7, %s257_s7 }
  0x3d   :  { %294 = vmatpush3.bf16.msra.mxu0 %v328_v2  ;;  %302 = vmatpush3.bf16.msra.mxu1 %v330_v6  ;;  %p406_p10 = scmp.ne.s32.totalorder %s257_s7, %s405_s8  ;;  %p411_p12 = scmp.lt.s32.totalorder %s405_s8, %s405_s8 }
  0x3e   :  { %303 = vmatprep.subr.bf16.mxu1 %v438_v0 }
  0x3f   :  { %p412_p13 = por %p411_p12, %p410_p11 }
  0x40   :  { %296 = vmatmul.mubr.msk.bf16.vlgmr.msra.gmra.mrb[0].mxu0 %vm86_vm1, %v62_v5 }
  0x41   :  { %304 = vmatpush3.bf16.msra.mxu1 %v331_v7  ;;  %p413_p0 = pnand %p412_p13, %p406_p10 }
  0x42   :  { %305 = vmatprep.subr.bf16.mxu1 %v438_v0 }
  0x45   :  { %306 = vmatpush3.bf16.msra.mxu1 %v332_v8 }
  0x46   :  { %307 = vmatprep.subr.bf16.mxu1 %v438_v0 }
  0x49   :  { %308 = vmatpush3.bf16.msra.mxu1 %v333_v9 }
  0x4a   :  { %309 = vmatprep.subr.bf16.mxu1 %v438_v0 }
  0x4d   :  { %310 = vmatpush3.bf16.msra.mxu1 %v334_v10 }
  0x4e   :  { %311 = vmatprep.subr.bf16.mxu1 %v438_v0 }
  0x51   :  { %312 = vmatpush3.bf16.msra.mxu1 %v335_v11 }
  0x52   :  { %313 = vmatprep.subr.bf16.mxu1 %v438_v0 }
  0x55   :  { %314 = vmatpush3.bf16.msra.mxu1 %v336_v12 }
 0x113   :  { %v124_v14 = vpop.f32.mrb[0].mxu0 }
 0x114   :  { %v125_v15 = vadd.f32 %v266_v13, %v124_v14  ;;  %v297_v16 = vpop.f32.mrb[1].mxu0 }
 0x115   :  { %v127_v17 = vpop.f32.mrb[2].mxu0 }
 0x116   :  { %v130_v18 = vmax.f32 %v125_v15, 0.0  ;;  %v298_v19 = vpop.f32.mrb[3].mxu0 }
 0x118   :  { %v131_v20 = vpack.c.bf16 %v130_v18, %v130_v18 }
 0x11a   :  { %316 = vmatmul.mubr.bf16.vlgmr.msra.gmra.mrb[0].mxu1 %v131_v20 }
 0x1ed   :  { %v237_v22 = vpop.f32.mrb[0].mxu1 }
 0x1ee   :  { %v238_v23 = vadd.f32 %v270_v21, %v237_v22  ;;  %v317_v24 = vpop.f32.mrb[1].mxu1 }
 0x1ef   :  { %v240_v25 = vpop.f32.mrb[2].mxu1 }
 0x1f0   :  { %v318_v26 = vpop.f32.mrb[3].mxu1  ;;  %v243_v27 = vmul.f32 %v238_v23, %v238_v23 }
 0x1f2   :  { %244 = vadd.xlane.f32.xlu0 %v243_v27 }
 0x27f   :  { %v245_v28 = vpop.xlane.xlu0 %244 }
 0x280   :  { %v246_v29 = vmax.f32 %v245_v28, 1e-24 }
 0x282   :  { %337 = vrsqrt.f32 %v246_v29 }
 0x28c   :  { %v338_v30 = vpop.eup %337 }
 0x28d   :  { %v248_v31 = vmul.f32 %v338_v30, %v238_v23 }
 0x28f   :  { %249 = vst [vmem:[#allocation8] sm:$0xff] %v248_v31 }
 0x290   :  { %416 = shalt.err (!%p413_p0)
}
 0x291   :  { %s417_s10 = scalar_lea.hbm %s536_s5, 128 }
 0x292   :  { %p418_p1 = scmp.ne.s32.totalorder %s536_s5, %s417_s10  ;;  %p421_p2 = scmp.lt.u32.totalorder %s417_s10, %s536_s5 }
 0x294   :  { %p423_p3 = pnand %p421_p2, %p418_p1 }
 0x296   :  { %426 = shalt.err (!%p423_p3)
}
 0x297   :  { %259 = dma.vmem_to_hbm [thread:$0]  %s257_s7, 128, %s536_s5, [#allocation4]  }
 0x298   :  { %431 = dma.done.wait [#allocation4], 128  }
 0x299   :  { %432 = vsyncadd [#allocation4], 4294967168 }
 0x29a   :  { %263 = vsyncpa [#allocation3], 1 }
 0x29b   :  { %264 = vsyncpa [#allocation6], 1 }
 0x29c   :  { %265 = vsyncpa [#allocation4], 1 }

</bundles_post_ra>
